<compile_context>
chip_gen: v5e
topology: v5e:2x2
jax: 0.10.0
libtpu: 0.0.40
codegen_flags: <defaults>
</compile_context>

<pallas_src>
import jax
import jax.numpy as jnp
import numpy as np
from jax import lax
from jax.experimental import pallas as pl
from jax.experimental.pallas import tpu as pltpu

FEAT = 1024                  # I3D feature dim (output of each encoder)
NCLS = 25                    # number of gesture classes
HEAD_COLS = 2 * NCLS         # [own head | cls_mm column block] = 50
OUT_LANES = 128              # lane-dense output slab width
PAD = OUT_LANES - 4 * NCLS   # 28 zero lanes of padding


def _heads_kernel(r_ref, o_ref, d_ref, wh_ref, bias_ref, out_ref):
    """All four Linear heads of ShareClassfier, fused into three NT matmuls.

    r/o/d : (B, 1024) f32 features (cast to bf16 in-kernel for the MXU)
    wh    : (3, 50, 1024) bf16, N-major.  Row j < 25  -> cls_m{i+1} output col j
                                          Row 25 + j  -> cls_mm output col j
                                          (column block i of the concat weight)
    bias  : (1, 128) f32 packed [b1 | b2 | b3 | bmm | 0*28]
    out   : (B, 128) f32 packed [m1 | m2 | m3 | mm | 0*28]
    """
    r = r_ref[...].astype(jnp.bfloat16)
    o = o_ref[...].astype(jnp.bfloat16)
    d = d_ref[...].astype(jnp.bfloat16)

    # Contract the feature dim of BOTH operands (weights are N-major / lane-dense).
    dn = (((1,), (1,)), ((), ()))
    y0 = lax.dot_general(r, wh_ref[0], dn, preferred_element_type=jnp.float32)  # (B, 50)
    y1 = lax.dot_general(o, wh_ref[1], dn, preferred_element_type=jnp.float32)  # (B, 50)
    y2 = lax.dot_general(d, wh_ref[2], dn, preferred_element_type=jnp.float32)  # (B, 50)

    # out_mm = rgb@wmm[0:1024] + of@wmm[1024:2048] + depth@wmm[2048:3072]
    mm = y0[:, NCLS:] + y1[:, NCLS:] + y2[:, NCLS:]                              # (B, 25)
    pad = jnp.zeros((y0.shape[0], PAD), jnp.float32)
    slab = jnp.concatenate([y0[:, :NCLS], y1[:, :NCLS], y2[:, :NCLS], mm, pad],
                           axis=1)                                               # (B, 128)
    out_ref[...] = slab + bias_ref[...]   # (1, 128) bias broadcast over rows


def pack_params(params):
    """One-time weight packing / bf16 cast (model-load time, NOT per step).

    NOTE (integration): weights here are (in_features, out_features); real
    PyTorch nn.Linear stores (out, in), so checkpoint loading must transpose,
    and the cls_mm column blocks must follow torch.cat([rgb, of, depth], dim=1)
    ordering.
    """
    w1, b1, w2, b2, w3, b3, wmm, bmm = params
    heads = []
    for i, w in enumerate((w1, w2, w3)):
        wmm_i = wmm[i * FEAT:(i + 1) * FEAT, :]                     # (1024, 25)
        heads.append(jnp.concatenate([w, wmm_i], axis=1).T)         # (50, 1024) N-major
    w_heads = jnp.stack(heads, axis=0).astype(jnp.bfloat16)         # (3, 50, 1024)
    bias = jnp.concatenate([b1, b2, b3, bmm,
                            jnp.zeros((PAD,), jnp.float32)]).reshape(1, OUT_LANES)
    return w_heads, bias.astype(jnp.float32)


@jax.jit
def share_classifier_heads(rgb_feat, of_feat, depth_feat, w_heads, bias):
    """(B,1024)x3 features -> (out_m1, out_m2, out_m3, out_mm), each (B,25) f32."""
    B = rgb_feat.shape[0]
    vmem = pl.BlockSpec(memory_space=pltpu.MemorySpace.VMEM)
    flops = 2 * B * FEAT * HEAD_COLS * 3
    bytes_accessed = (3 * B * FEAT * 4          # f32 features
                      + w_heads.size * 2        # bf16 weights
                      + bias.size * 4           # f32 bias slab
                      + B * OUT_LANES * 4)      # f32 output slab
    slab = pl.pallas_call(
        _heads_kernel,
        out_shape=jax.ShapeDtypeStruct((B, OUT_LANES), jnp.float32),
        in_specs=[vmem] * 5,
        out_specs=vmem,
        cost_estimate=pl.CostEstimate(flops=flops, transcendentals=0,
                                      bytes_accessed=bytes_accessed),
    )(rgb_feat, of_feat, depth_feat, w_heads, bias)
    return (slab[:, 0 * NCLS:1 * NCLS], slab[:, 1 * NCLS:2 * NCLS],
            slab[:, 2 * NCLS:3 * NCLS], slab[:, 3 * NCLS:4 * NCLS])


def _init_linear(key, fan_in, fan_out):
    """PyTorch-style nn.Linear init; weight returned (in, out) for feat @ W."""
    kw, kb = jax.random.split(key)
    bound = 1.0 / np.sqrt(fan_in)
    w = jax.random.uniform(kw, (fan_in, fan_out), jnp.float32, -bound, bound)
    b = jax.random.uniform(kb, (fan_out,), jnp.float32, -bound, bound)
    return w, b


def _reference_f32(rgb, of, depth, params):
    """Module semantics (full f32), matching the PyTorch forward."""
    w1, b1, w2, b2, w3, b3, wmm, bmm = params
    cat = jnp.concatenate([rgb, of, depth], axis=1)
    return (rgb @ w1 + b1, of @ w2 + b2, depth @ w3 + b3, cat @ wmm + bmm)


def _reference_bf16(rgb, of, depth, params):
    """Matched-precision reference: bf16 operands, f32 accumulation, f32 bias."""
    w1, b1, w2, b2, w3, b3, wmm, bmm = params

    def mm(x, w):
        return jnp.dot(x.astype(jnp.bfloat16), w.astype(jnp.bfloat16),
                       preferred_element_type=jnp.float32)

    cat = jnp.concatenate([rgb, of, depth], axis=1)
    return (mm(rgb, w1) + b1, mm(of, w2) + b2, mm(depth, w3) + b3,
            mm(cat, wmm) + bmm)


if __name__ == "__main__":
    key = jax.random.PRNGKey(0)
    k_r, k_o, k_d, k1, k2, k3, kmm = jax.random.split(key, 7)

    B = 8  # small batch; features are what the I3D encoders would output
    rgb = jax.random.normal(k_r, (B, FEAT), jnp.float32)
    of = jax.random.normal(k_o, (B, FEAT), jnp.float32)
    depth = jax.random.normal(k_d, (B, FEAT), jnp.float32)

    w1, b1 = _init_linear(k1, FEAT, NCLS)          # cls_m1
    w2, b2 = _init_linear(k2, FEAT, NCLS)          # cls_m2
    w3, b3 = _init_linear(k3, FEAT, NCLS)          # cls_m3
    wmm, bmm = _init_linear(kmm, 3 * FEAT, NCLS)   # cls_mm
    params = (w1, b1, w2, b2, w3, b3, wmm, bmm)

    packed = jax.block_until_ready(pack_params(params))   # one-time packing

    outs = share_classifier_heads(rgb, of, depth, *packed)
    outs = jax.block_until_ready(outs)

    refs_bf16 = _reference_bf16(rgb, of, depth, params)
    refs_f32 = _reference_f32(rgb, of, depth, params)
    for got, want_bf16, want_f32 in zip(outs, refs_bf16, refs_f32):
        assert got.shape == (B, NCLS) and got.dtype == jnp.float32
        # Tight check vs. matched-precision (bf16 in, f32 acc) reference.
        np.testing.assert_allclose(np.asarray(got), np.asarray(want_bf16),
                                   rtol=1e-4, atol=1e-4)
        # Loose check vs. full-f32 module semantics (bf16 input rounding gives
        # ~1e-3 abs error at these magnitudes; fine for argmax classification).
        np.testing.assert_allclose(np.asarray(got), np.asarray(want_f32),
                                   rtol=2e-2, atol=2e-2)

    print("KERNEL_OK")
</pallas_src>

<mosaic_0001>
module attributes {stable_mosaic.version = 11 : i64} {
  func.func @_heads_kernel(%arg0: memref<8x1024xf32, #tpu.memory_space<vmem>>, %arg1: memref<8x1024xf32, #tpu.memory_space<vmem>>, %arg2: memref<8x1024xf32, #tpu.memory_space<vmem>>, %arg3: memref<3x50x1024xbf16, #tpu.memory_space<vmem>>, %arg4: memref<1x128xf32, #tpu.memory_space<vmem>>, %arg5: memref<8x128xf32, #tpu.memory_space<vmem>>) attributes {dimension_semantics = [], scalar_prefetch = 0 : i64, scratch_operands = 0 : i64, tpu.core_type = #tpu.core_type<tc>} {
    %c0 = arith.constant 0 : index
    %c0_0 = arith.constant 0 : index
    %0 = vector.load %arg0[%c0, %c0_0] : memref<8x1024xf32, #tpu.memory_space<vmem>>, vector<8x1024xf32>
    %1 = arith.truncf %0 : vector<8x1024xf32> to vector<8x1024xbf16>
    %c0_1 = arith.constant 0 : index
    %c0_2 = arith.constant 0 : index
    %2 = vector.load %arg1[%c0_1, %c0_2] : memref<8x1024xf32, #tpu.memory_space<vmem>>, vector<8x1024xf32>
    %3 = arith.truncf %2 : vector<8x1024xf32> to vector<8x1024xbf16>
    %c0_3 = arith.constant 0 : index
    %c0_4 = arith.constant 0 : index
    %4 = vector.load %arg2[%c0_3, %c0_4] : memref<8x1024xf32, #tpu.memory_space<vmem>>, vector<8x1024xf32>
    %5 = arith.truncf %4 : vector<8x1024xf32> to vector<8x1024xbf16>
    %c0_5 = arith.constant 0 : index
    %c0_6 = arith.constant 0 : index
    %c0_7 = arith.constant 0 : index
    %6 = vector.load %arg3[%c0_5, %c0_6, %c0_7] : memref<3x50x1024xbf16, #tpu.memory_space<vmem>>, vector<1x50x1024xbf16>
    %7 = vector.shape_cast %6 : vector<1x50x1024xbf16> to vector<50x1024xbf16>
    %cst = arith.constant dense<0.000000e+00> : vector<8x50xf32>
    %8 = tpu.matmul %1, %7, %cst {dimension_numbers = #tpu.dot_dimension_numbers<[1], [1], [0], [0], [0, 0, 1, 0], [], []>} : vector<8x1024xbf16>, vector<50x1024xbf16>, vector<8x50xf32> -> vector<8x50xf32>
    %c1 = arith.constant 1 : index
    %c0_8 = arith.constant 0 : index
    %c0_9 = arith.constant 0 : index
    %9 = vector.load %arg3[%c1, %c0_8, %c0_9] : memref<3x50x1024xbf16, #tpu.memory_space<vmem>>, vector<1x50x1024xbf16>
    %10 = vector.shape_cast %9 : vector<1x50x1024xbf16> to vector<50x1024xbf16>
    %cst_10 = arith.constant dense<0.000000e+00> : vector<8x50xf32>
    %11 = tpu.matmul %3, %10, %cst_10 {dimension_numbers = #tpu.dot_dimension_numbers<[1], [1], [0], [0], [0, 0, 1, 0], [], []>} : vector<8x1024xbf16>, vector<50x1024xbf16>, vector<8x50xf32> -> vector<8x50xf32>
    %c2 = arith.constant 2 : index
    %c0_11 = arith.constant 0 : index
    %c0_12 = arith.constant 0 : index
    %12 = vector.load %arg3[%c2, %c0_11, %c0_12] : memref<3x50x1024xbf16, #tpu.memory_space<vmem>>, vector<1x50x1024xbf16>
    %13 = vector.shape_cast %12 : vector<1x50x1024xbf16> to vector<50x1024xbf16>
    %cst_13 = arith.constant dense<0.000000e+00> : vector<8x50xf32>
    %14 = tpu.matmul %5, %13, %cst_13 {dimension_numbers = #tpu.dot_dimension_numbers<[1], [1], [0], [0], [0, 0, 1, 0], [], []>} : vector<8x1024xbf16>, vector<50x1024xbf16>, vector<8x50xf32> -> vector<8x50xf32>
    %15 = vector.extract_strided_slice %8 {offsets = [0, 25], sizes = [8, 25], strides = [1, 1]} : vector<8x50xf32> to vector<8x25xf32>
    %16 = vector.extract_strided_slice %11 {offsets = [0, 25], sizes = [8, 25], strides = [1, 1]} : vector<8x50xf32> to vector<8x25xf32>
    %17 = arith.addf %15, %16 : vector<8x25xf32>
    %18 = vector.extract_strided_slice %14 {offsets = [0, 25], sizes = [8, 25], strides = [1, 1]} : vector<8x50xf32> to vector<8x25xf32>
    %19 = arith.addf %17, %18 : vector<8x25xf32>
    %cst_14 = arith.constant 0.000000e+00 : f32
    %20 = vector.broadcast %cst_14 : f32 to vector<8x28xf32>
    %21 = vector.extract_strided_slice %8 {offsets = [0, 0], sizes = [8, 25], strides = [1, 1]} : vector<8x50xf32> to vector<8x25xf32>
    %22 = vector.extract_strided_slice %11 {offsets = [0, 0], sizes = [8, 25], strides = [1, 1]} : vector<8x50xf32> to vector<8x25xf32>
    %23 = vector.extract_strided_slice %14 {offsets = [0, 0], sizes = [8, 25], strides = [1, 1]} : vector<8x50xf32> to vector<8x25xf32>
    %24 = tpu.concatenate %21, %22, %23, %19, %20 in 1 : vector<8x25xf32>, vector<8x25xf32>, vector<8x25xf32>, vector<8x25xf32>, vector<8x28xf32> -> vector<8x128xf32>
    %c0_15 = arith.constant 0 : index
    %c0_16 = arith.constant 0 : index
    %25 = vector.load %arg4[%c0_15, %c0_16] : memref<1x128xf32, #tpu.memory_space<vmem>>, vector<1x128xf32>
    %26 = vector.broadcast %25 : vector<1x128xf32> to vector<8x128xf32>
    %27 = arith.addf %24, %26 : vector<8x128xf32>
    %c0_17 = arith.constant 0 : index
    %c0_18 = arith.constant 0 : index
    %28 = vector.load %arg5[%c0_17, %c0_18] : memref<8x128xf32, #tpu.memory_space<vmem>>, vector<8x128xf32>
    tpu.vector_store %arg5[%c0_17, %c0_18], %27 {strides = array<i32>} : memref<8x128xf32, #tpu.memory_space<vmem>>, vector<8x128xf32>,
    return
  }
}

</mosaic_0001>

<bundles_post_ra>
// kernel: share_classifier_heads.1
= control target key start
LH: loop header
LB: loop body
LE: loop exit
PB: predicated region body
PF: predicated region fallthrough
CT: control target
= control target key end

     0   :  { %10 = vsyncpa [#allocation3], 0  ;;  %s1530_s0 = inlined_call_operand.hbm [shape: f32[8,1024], index: 0, kind: input, shape index: {}]   ;;  %s1531_s1 = inlined_call_operand.hbm [shape: f32[8,1024], index: 1, kind: input, shape index: {}]   ;;  %s1532_s2 = inlined_call_operand.hbm [shape: f32[8,1024], index: 2, kind: input, shape index: {}]   ;;  %s1533_s3 = inlined_call_operand.hbm [shape: bf16[3,50,1024], index: 3, kind: input, shape index: {}]   ;;  %s1534_s4 = inlined_call_operand.vmem [shape: f32[1,128], index: 4, kind: input, shape index: {}]   ;;  %s1535_s5 = inlined_call_operand.vmem [shape: f32[8,128], index: 5, kind: output, shape index: {}]  }
   0x1   :  { %11 = vsyncpa [#allocation5], 0  ;;  %s29_s20 = sshll.u32 %s1531_s1, 4  ;;  %s30_s20 = int_to_ptr.hbm [resolvable:$true] %s29_s20 }
   0x2   :  { %12 = vsyncpa [#allocation8], 0  ;;  %s1474_s21 = smov [#allocation4]   ;;  %s18_s25 = sshll.u32 %s1530_s0, 4  ;;  %s19_s25 = int_to_ptr.hbm [resolvable:$true] %s18_s25 }
   0x3   :  { %s31_s22 = sshll.u32 %s1474_s21, 4  ;;  %s1475_s26 = smov [#allocation2]   ;;  %s32_s22 = int_to_ptr.vmem [resolvable:$true] %s31_s22 }
   0x4   :  { %34 = dma.hbm_to_vmem [thread:$0]  %s30_s20, 1024, %s32_s22, [#allocation5]  }
   0x5   :  { %s20_s27 = sshll.u32 %s1475_s26, 4  ;;  %s40_s30 = sshll.u32 %s1532_s2, 4  ;;  %s21_s27 = int_to_ptr.vmem [resolvable:$true] %s20_s27  ;;  %s41_s30 = int_to_ptr.hbm [resolvable:$true] %s40_s30 }
   0x6   :  { %23 = dma.hbm_to_vmem [thread:$0]  %s19_s25, 1024, %s21_s27, [#allocation3]  }
   0x7   :  { %s50_s7 = sshll.u32 %s1533_s3, 4  ;;  %s1476_s8 = smov [#allocation6]   ;;  %s51_s7 = int_to_ptr.hbm [resolvable:$true] %s50_s7 }
   0x8   :  { %s42_s9 = sshll.u32 %s1476_s8, 4  ;;  %s1477_s0 = smov [#allocation7]   ;;  %s43_s9 = int_to_ptr.vmem [resolvable:$true] %s42_s9 }
   0x9   :  { %45 = dma.hbm_to_vmem [thread:$0]  %s41_s30, 1024, %s43_s9, [#allocation5]  }
   0xa   :  { %s52_s10 = sshll.u32 %s1477_s0, 4  ;;  %s1478_s11 = smov 512   ;;  %s53_s10 = int_to_ptr.vmem [resolvable:$true] %s52_s10 }
   0xb   :  { %s1479_s12 = smov 32  }
   0xc   :  { %58 = dma.hbm_to_vmem [thread:$0]  %s51_s7, 10752, %s53_s10, [#allocation8], %s1478_s11, %s1478_s11, %s1479_s12  }
   0xd   :  { %1468 = dma.done.wait [#allocation3], 1024  }
   0xe   :  { %1469 = vsyncadd [#allocation3], 4294966272 }
   0xf   :  { %1470 = dma.done.wait [#allocation5], 2048  }
  0x10   :  { %1471 = vsyncadd [#allocation5], 4294965248 }
  0x11   :  { %1472 = dma.done.wait [#allocation8], 10752  }
  0x12   :  { %1473 = vsyncadd [#allocation8], 4294956544  ;;  %v150_v0 = vld [vmem:[#allocation7 + $0xc0] sm:$0x11]  ;;  %v151_v1 = vld [vmem:[#allocation7 + $0xc8] sm:$0x11] }
  0x13   :  { %v230_v2 = vunpack.c.l.b16 %v150_v0  ;;  %v231_v3 = vunpack.c.h.b16 %v150_v0  ;;  %v232_v4 = vunpack.c.l.b16 %v151_v1  ;;  %v233_v5 = vunpack.c.h.b16 %v151_v1  ;;  %v1069_v10 = vld [vmem:[#allocation7 + $0x80] sm:$0xf]  ;;  %v1307_v12 = vld [vmem:[#allocation7 + $0x84] sm:$0xf]  ;;  %v1077_v14 = vld [vmem:[#allocation7 + $0x88] sm:$0xf] }
  0x14   :  { %v1311_v11 = vld [vmem:[#allocation7 + $0x9c] sm:$0xf0]  ;;  %v1071_v13 = vld [vmem:[#allocation7 + $0xa0] sm:$0xf0]  ;;  %v1312_v15 = vld [vmem:[#allocation7 + $0xa4] sm:$0xf0] }
  0x15   :  { %v262_v6 = vpack.c.b16 %v230_v2, %v230_v2  ;;  %v263_v7 = vpack.c.b16 %v231_v3, %v231_v3  ;;  %v264_v8 = vpack.c.b16 %v232_v4, %v232_v4  ;;  %v265_v9 = vpack.c.b16 %v233_v5, %v233_v5  ;;  %v1308_v16 = vld [vmem:[#allocation7 + $0x8c] sm:$0xf]  ;;  %v1037_v22 = vld [vmem:[#allocation7 + $0x40] sm:$0xf]  ;;  %v1299_v24 = vld [vmem:[#allocation7 + $0x44] sm:$0xf] }
  0x16   :  { %v1079_v17 = vld [vmem:[#allocation7 + $0xa8] sm:$0xf0]  ;;  %v1070_v18 = vor.u32 %v1311_v11, %v1069_v10  ;;  %v1074_v19 = vor.u32 %v1307_v12, %v1071_v13  ;;  %v1078_v20 = vor.u32 %v1312_v15, %v1077_v14  ;;  %v1303_v23 = vld [vmem:[#allocation7 + $0x5c] sm:$0xf0]  ;;  %v1039_v25 = vld [vmem:[#allocation7 + $0x60] sm:$0xf0] }
  0x17   :  { %306 = vmatpush.bf16.xpose.msra.mxu0 %v262_v6  ;;  %319 = vmatpush.bf16.xpose.msra.mxu1 %v263_v7  ;;  %v1082_v21 = vor.u32 %v1308_v16, %v1079_v17  ;;  %v1045_v26 = vld [vmem:[#allocation7 + $0x48] sm:$0xf]  ;;  %v1300_v28 = vld [vmem:[#allocation7 + $0x4c] sm:$0xf]  ;;  %v1038_v30 = vor.u32 %v1303_v23, %v1037_v22  ;;  %v1042_v31 = vor.u32 %v1299_v24, %v1039_v25  ;;  %v152_v34 = vld [vmem:[#allocation7 + $0xd0] sm:$0x11] }
  0x18   :  { %332 = vmatpush.bf16.xpose.msra.mxu2 %v264_v8  ;;  %345 = vmatpush.bf16.xpose.msra.mxu3 %v265_v9  ;;  %v1304_v27 = vld [vmem:[#allocation7 + $0x64] sm:$0xf0]  ;;  %v1047_v29 = vld [vmem:[#allocation7 + $0x68] sm:$0xf0]  ;;  %v1005_v35 = vld [vmem:[#allocation7] sm:$0xf]  ;;  %v234_v44 = vunpack.c.l.b16 %v152_v34  ;;  %v235_v45 = vunpack.c.h.b16 %v152_v34 }
  0x19   :  { %v1046_v32 = vor.u32 %v1304_v27, %v1045_v26  ;;  %v1050_v33 = vor.u32 %v1300_v28, %v1047_v29  ;;  %v1295_v36 = vld [vmem:[#allocation7 + $0x1c] sm:$0xf0]  ;;  %v153_v37 = vld [vmem:[#allocation7 + $0xd8] sm:$0x11]  ;;  %v1291_v38 = vld [vmem:[#allocation7 + $0x4] sm:$0xf] }
  0x1a   :  { %v1007_v39 = vld [vmem:[#allocation7 + $0x20] sm:$0xf0]  ;;  %v1013_v40 = vld [vmem:[#allocation7 + $0x8] sm:$0xf]  ;;  %v1292_v42 = vld [vmem:[#allocation7 + $0xc] sm:$0xf]  ;;  %v236_v46 = vunpack.c.l.b16 %v153_v37  ;;  %v237_v47 = vunpack.c.h.b16 %v153_v37  ;;  %v1006_v48 = vor.u32 %v1295_v36, %v1005_v35  ;;  %v266_v52 = vpack.c.b16 %v234_v44, %v234_v44 }
  0x1b   :  { %v1296_v41 = vld [vmem:[#allocation7 + $0x24] sm:$0xf0]  ;;  %v1015_v43 = vld [vmem:[#allocation7 + $0x28] sm:$0xf0]  ;;  %v1010_v49 = vor.u32 %v1291_v38, %v1007_v39  ;;  %v267_v53 = vpack.c.b16 %v235_v45, %v235_v45  ;;  %v78_v56 = vld [vmem:[#allocation2] sm:$0xff]  ;;  %s1480_s2 = smov 25  }
  0x1c   :  { %v1014_v50 = vor.u32 %v1296_v41, %v1013_v40  ;;  %v1018_v51 = vor.u32 %v1292_v42, %v1015_v43  ;;  %v268_v54 = vpack.c.b16 %v236_v46, %v236_v46  ;;  %v269_v55 = vpack.c.b16 %v237_v47, %v237_v47  ;;  %v79_v57 = vld [vmem:[#allocation2 + $0x8] sm:$0xff]  ;;  %v80_v58 = vld [vmem:[#allocation2 + $0x10] sm:$0xff]  ;;  %v81_v59 = vld [vmem:[#allocation2 + $0x18] sm:$0xff]  ;;  %s1481_s3 = smov 50  }
  0x1d   :  { %v1085_v60 = vld [vmem:[#allocation7 + $0x90] sm:$0xf]  ;;  %v1309_v62 = vld [vmem:[#allocation7 + $0x94] sm:$0xf]  ;;  %v1093_v0 = vld [vmem:[#allocation7 + $0x98] sm:$0xf]  ;;  %v86_v1 = vpack.c.bf16 %v78_v56, %v78_v56  ;;  %v87_v2 = vpack.c.bf16 %v79_v57, %v79_v57  ;;  %v88_v6 = vpack.c.bf16 %v80_v58, %v80_v58  ;;  %v89_v7 = vpack.c.bf16 %v81_v59, %v81_v59 }
  0x1e   :  { %v1313_v61 = vld [vmem:[#allocation7 + $0xac] sm:$0xf0]  ;;  %v1087_v63 = vld [vmem:[#allocation7 + $0xb0] sm:$0xf0]  ;;  %v1314_v3 = vld [vmem:[#allocation7 + $0xb4] sm:$0xf0] }
  0x1f   :  { %307 = vmatpush.bf16.xpose.msra.mxu0 %v1070_v18  ;;  %320 = vmatpush.bf16.xpose.msra.mxu1 %v1074_v19  ;;  %v1310_v4 = vld [vmem:[#allocation7 + $0x9c] sm:$0xf]  ;;  %v1086_v8 = vor.u32 %v1313_v61, %v1085_v60  ;;  %v1090_v9 = vor.u32 %v1309_v62, %v1087_v63  ;;  %v1094_v10 = vor.u32 %v1314_v3, %v1093_v0  ;;  %v1053_v12 = vld [vmem:[#allocation7 + $0x50] sm:$0xf]  ;;  %v1301_v14 = vld [vmem:[#allocation7 + $0x54] sm:$0xf] }
  0x20   :  { %333 = vmatpush.bf16.xpose.msra.mxu2 %v1078_v20  ;;  %346 = vmatpush.bf16.xpose.msra.mxu3 %v1082_v21  ;;  %v1095_v5 = vld [vmem:[#allocation7 + $0xb8] sm:$0xf0]  ;;  %v1305_v13 = vld [vmem:[#allocation7 + $0x6c] sm:$0xf0]  ;;  %v1055_v15 = vld [vmem:[#allocation7 + $0x70] sm:$0xf0] }
  0x21   :  { %v1098_v11 = vor.u32 %v1310_v4, %v1095_v5  ;;  %v1061_v16 = vld [vmem:[#allocation7 + $0x58] sm:$0xf]  ;;  %v1302_v18 = vld [vmem:[#allocation7 + $0x5c] sm:$0xf]  ;;  %v1054_v20 = vor.u32 %v1305_v13, %v1053_v12  ;;  %v1058_v21 = vor.u32 %v1301_v14, %v1055_v15  ;;  %v431_v24 = vld [vmem:[#allocation7 + $0x1a0] sm:$0x11] }
  0x22   :  { %v1306_v17 = vld [vmem:[#allocation7 + $0x74] sm:$0xf0]  ;;  %v1063_v19 = vld [vmem:[#allocation7 + $0x78] sm:$0xf0]  ;;  %v1021_v25 = vld [vmem:[#allocation7 + $0x10] sm:$0xf]  ;;  %v511_v34 = vunpack.c.l.b16 %v431_v24  ;;  %v512_v35 = vunpack.c.h.b16 %v431_v24 }
  0x23   :  { %v1062_v22 = vor.u32 %v1306_v17, %v1061_v16  ;;  %v1066_v23 = vor.u32 %v1302_v18, %v1063_v19  ;;  %v1297_v26 = vld [vmem:[#allocation7 + $0x2c] sm:$0xf0]  ;;  %v432_v27 = vld [vmem:[#allocation7 + $0x1a8] sm:$0x11]  ;;  %v1293_v28 = vld [vmem:[#allocation7 + $0x14] sm:$0xf] }
  0x24   :  { %v1023_v29 = vld [vmem:[#allocation7 + $0x30] sm:$0xf0]  ;;  %v513_v36 = vunpack.c.l.b16 %v432_v27  ;;  %v514_v37 = vunpack.c.h.b16 %v432_v27  ;;  %v1022_v38 = vor.u32 %v1297_v26, %v1021_v25  ;;  %v543_v42 = vpack.c.b16 %v511_v34, %v511_v34  ;;  %v82_v46 = vld [vmem:[#allocation2 + $0x20] sm:$0xff]  ;;  %v83_v47 = vld [vmem:[#allocation2 + $0x28] sm:$0xff] }
  0x25   :  { %v1026_v39 = vor.u32 %v1293_v28, %v1023_v29  ;;  %v544_v43 = vpack.c.b16 %v512_v35, %v512_v35  ;;  %v91_v56 = vpack.c.bf16 %v83_v47, %v83_v47  ;;  %v1336_v59 = vld [vmem:[#allocation7 + $0x184] sm:$0xf0]  ;;  %v1332_v60 = vld [vmem:[#allocation7 + $0x16c] sm:$0xf]  ;;  %v1327_v3 = vld [vmem:[#allocation7 + $0x13c] sm:$0xf0] }
  0x26   :  { %v545_v44 = vpack.c.b16 %v513_v36, %v513_v36  ;;  %v546_v45 = vpack.c.b16 %v514_v37, %v514_v37  ;;  %v1175_v61 = vld [vmem:[#allocation7 + $0x188] sm:$0xf0]  ;;  %v1323_v4 = vld [vmem:[#allocation7 + $0x124] sm:$0xf]  ;;  %v433_v14 = vld [vmem:[#allocation7 + $0x1b0] sm:$0x11] }
  0x27   :  { %308 = vmatpush.bf16.xpose.msra.mxu0 %v1038_v30  ;;  %321 = vmatpush.bf16.xpose.msra.mxu1 %v1042_v31  ;;  %v1029_v30 = vld [vmem:[#allocation7 + $0x18] sm:$0xf]  ;;  %v1135_v5 = vld [vmem:[#allocation7 + $0x140] sm:$0xf0]  ;;  %v1101_v15 = vld [vmem:[#allocation7 + $0xe0] sm:$0xf]  ;;  %v515_v24 = vunpack.c.l.b16 %v433_v14  ;;  %v516_v25 = vunpack.c.h.b16 %v433_v14 }
  0x28   :  { %334 = vmatpush.bf16.xpose.msra.mxu2 %v1046_v32  ;;  %347 = vmatpush.bf16.xpose.msra.mxu3 %v1050_v33  ;;  %v1298_v31 = vld [vmem:[#allocation7 + $0x34] sm:$0xf0]  ;;  %v1294_v32 = vld [vmem:[#allocation7 + $0x1c] sm:$0xf]  ;;  %v1319_v16 = vld [vmem:[#allocation7 + $0xfc] sm:$0xf0] }
  0x29   :  { %v1031_v33 = vld [vmem:[#allocation7 + $0x38] sm:$0xf0]  ;;  %v1030_v40 = vor.u32 %v1298_v31, %v1029_v30  ;;  %v1315_v18 = vld [vmem:[#allocation7 + $0xe4] sm:$0xf]  ;;  %v1102_v28 = vor.u32 %v1319_v16, %v1101_v15  ;;  %v95_v37 = vld [vmem:[#allocation4 + $0x8] sm:$0xff]  ;;  %vm982_vm0 = vcmask 203776  }
  0x2a   :  { %v1034_v41 = vor.u32 %v1294_v32, %v1031_v33  ;;  %v434_v17 = vld [vmem:[#allocation7 + $0x1b8] sm:$0x11]  ;;  %v1103_v19 = vld [vmem:[#allocation7 + $0x100] sm:$0xf0]  ;;  %v547_v32 = vpack.c.b16 %v515_v24, %v515_v24  ;;  %v548_v33 = vpack.c.b16 %v516_v25, %v516_v25  ;;  %vm984_vm1 = vcmask 408576  }
  0x2b   :  { %v517_v26 = vunpack.c.l.b16 %v434_v17  ;;  %v518_v27 = vunpack.c.h.b16 %v434_v17  ;;  %v1106_v29 = vor.u32 %v1315_v18, %v1103_v19  ;;  %v94_v36 = vld [vmem:[#allocation4] sm:$0xff]  ;;  %v1338_v47 = vld [vmem:[#allocation7 + $0x194] sm:$0xf0]  ;;  %vm986_vm2 = vcmask 613376  }
  0x2c   :  { %vm988_vm3 = vcmask 818176  }
  0x2d   :  { %v549_v34 = vpack.c.b16 %v517_v26, %v517_v26  ;;  %v550_v35 = vpack.c.b16 %v518_v27, %v518_v27  ;;  %v98_v26 = vld [vmem:[#allocation4 + $0x20] sm:$0xff]  ;;  %v99_v27 = vld [vmem:[#allocation4 + $0x28] sm:$0xff] }
  0x2f   :  { %309 = vmatpush.bf16.xpose.msra.mxu0 %v1006_v48  ;;  %322 = vmatpush.bf16.xpose.msra.mxu1 %v1010_v49  ;;  %v84_v48 = vld [vmem:[#allocation2 + $0x30] sm:$0xff]  ;;  %v85_v49 = vld [vmem:[#allocation2 + $0x38] sm:$0xff] }
  0x30   :  { %335 = vmatpush.bf16.xpose.msra.mxu2 %v1014_v50  ;;  %348 = vmatpush.bf16.xpose.msra.mxu3 %v1018_v51  ;;  %v1165_v50 = vld [vmem:[#allocation7 + $0x160] sm:$0xf]  ;;  %v92_v57 = vpack.c.bf16 %v84_v48, %v84_v48  ;;  %v93_v58 = vpack.c.bf16 %v85_v49, %v85_v49  ;;  %v1334_v48 = vld [vmem:[#allocation7 + $0x17c] sm:$0xf] }
  0x31   :  { %v1335_v51 = vld [vmem:[#allocation7 + $0x17c] sm:$0xf0]  ;;  %v1191_v49 = vld [vmem:[#allocation7 + $0x198] sm:$0xf0] }
  0x32   :  { %v1166_v62 = vor.u32 %v1335_v51, %v1165_v50 }
  0x36   :  { %310 = vmatmul.bf16.vlgmr.msra.gmra.mxu0 %v86_v1  ;;  %323 = vmatmul.bf16.vlgmr.msra.gmra.mxu1 %v87_v2  ;;  %v1178_v1 = vor.u32 %v1332_v60, %v1175_v61  ;;  %v1133_v2 = vld [vmem:[#allocation7 + $0x120] sm:$0xf]  ;;  %v1157_v60 = vld [vmem:[#allocation7 + $0x138] sm:$0xf] }
  0x37   :  { %358 = vmatpush.bf16.xpose.msrb.mxu0 %v266_v52  ;;  %371 = vmatpush.bf16.xpose.msrb.mxu1 %v267_v53  ;;  %v90_v52 = vpack.c.bf16 %v82_v46, %v82_v46  ;;  %v1331_v53 = vld [vmem:[#allocation7 + $0x164] sm:$0xf]  ;;  %v103_v46 = vpack.c.bf16 %v95_v37, %v95_v37  ;;  %v1330_v61 = vld [vmem:[#allocation7 + $0x154] sm:$0xf0] }
  0x38   :  { %384 = vmatpush.bf16.xpose.msrb.mxu2 %v268_v54  ;;  %397 = vmatpush.bf16.xpose.msrb.mxu3 %v269_v55  ;;  %v1167_v54 = vld [vmem:[#allocation7 + $0x180] sm:$0xf0]  ;;  %v1173_v55 = vld [vmem:[#allocation7 + $0x168] sm:$0xf] }
  0x39   :  { %336 = vmatmul.bf16.vlgmr.msra.gmra.mxu2 %v88_v6  ;;  %349 = vmatmul.bf16.vlgmr.msra.gmra.mxu3 %v89_v7  ;;  %v1170_v63 = vor.u32 %v1331_v53, %v1167_v54  ;;  %v1174_v0 = vor.u32 %v1336_v59, %v1173_v55  ;;  %v1141_v6 = vld [vmem:[#allocation7 + $0x128] sm:$0xf]  ;;  %v1194_v55 = vor.u32 %v1334_v48, %v1191_v49  ;;  %v1151_v59 = vld [vmem:[#allocation7 + $0x150] sm:$0xf0]  ;;  %v1347_v48 = vld [vmem:[#allocation7 + $0x204] sm:$0xf] }
  0x3a   :  { %v1328_v7 = vld [vmem:[#allocation7 + $0x144] sm:$0xf0]  ;;  %v1231_v49 = vld [vmem:[#allocation7 + $0x220] sm:$0xf0] }
  0x3b   :  { %v1142_v12 = vor.u32 %v1328_v7, %v1141_v6  ;;  %v1321_v6 = vld [vmem:[#allocation7 + $0x10c] sm:$0xf0]  ;;  %v713_v7 = vld [vmem:[#allocation7 + $0x288] sm:$0x11] }
  0x3c   :  { %v794_v16 = vunpack.c.l.b16 %v713_v7  ;;  %v795_v17 = vunpack.c.h.b16 %v713_v7 }
  0x3e   :  { %v826_v24 = vpack.c.b16 %v794_v16, %v794_v16  ;;  %v827_v25 = vpack.c.b16 %v795_v17, %v795_v17  ;;  %v110_v16 = vld [vmem:[#allocation6] sm:$0xff]  ;;  %v111_v17 = vld [vmem:[#allocation6 + $0x8] sm:$0xff] }
  0x3f   :  { %359 = vmatpush.bf16.xpose.msrb.mxu0 %v1086_v8  ;;  %372 = vmatpush.bf16.xpose.msrb.mxu1 %v1090_v9  ;;  %v1324_v8 = vld [vmem:[#allocation7 + $0x12c] sm:$0xf] }
  0x40   :  { %385 = vmatpush.bf16.xpose.msrb.mxu2 %v1094_v10  ;;  %398 = vmatpush.bf16.xpose.msrb.mxu3 %v1098_v11  ;;  %v1143_v9 = vld [vmem:[#allocation7 + $0x148] sm:$0xf0]  ;;  %v1134_v10 = vor.u32 %v1327_v3, %v1133_v2  ;;  %v1138_v11 = vor.u32 %v1323_v4, %v1135_v5  ;;  %v1158_v2 = vor.u32 %v1330_v61, %v1157_v60  ;;  %v712_v4 = vld [vmem:[#allocation7 + $0x280] sm:$0x11]  ;;  %v1117_v5 = vld [vmem:[#allocation7 + $0xf0] sm:$0xf] }
  0x41   :  { %v1146_v13 = vor.u32 %v1324_v8, %v1143_v9  ;;  %v1317_v8 = vld [vmem:[#allocation7 + $0xf4] sm:$0xf]  ;;  %v792_v14 = vunpack.c.l.b16 %v712_v4  ;;  %v793_v15 = vunpack.c.h.b16 %v712_v4  ;;  %v1118_v18 = vor.u32 %v1321_v6, %v1117_v5  ;;  %v1343_v60 = vld [vmem:[#allocation7 + $0x1dc] sm:$0xf0]  ;;  %v715_v61 = vld [vmem:[#allocation7 + $0x298] sm:$0x11] }
  0x42   :  { %v1119_v9 = vld [vmem:[#allocation7 + $0x110] sm:$0xf0]  ;;  %v798_v6 = vunpack.c.l.b16 %v715_v61  ;;  %v799_v7 = vunpack.c.h.b16 %v715_v61  ;;  %v115_v61 = vld [vmem:[#allocation6 + $0x28] sm:$0xff] }
  0x43   :  { %v1122_v19 = vor.u32 %v1317_v8, %v1119_v9 }
  0x47   :  { %360 = vmatpush.bf16.xpose.msrb.mxu0 %v1054_v20  ;;  %373 = vmatpush.bf16.xpose.msrb.mxu1 %v1058_v21  ;;  %v1109_v20 = vld [vmem:[#allocation7 + $0xe8] sm:$0xf] }
  0x48   :  { %386 = vmatpush.bf16.xpose.msrb.mxu2 %v1062_v22  ;;  %399 = vmatpush.bf16.xpose.msrb.mxu3 %v1066_v23  ;;  %v1320_v21 = vld [vmem:[#allocation7 + $0x104] sm:$0xf0]  ;;  %v1316_v22 = vld [vmem:[#allocation7 + $0xec] sm:$0xf] }
  0x49   :  { %v1111_v23 = vld [vmem:[#allocation7 + $0x108] sm:$0xf0]  ;;  %v1110_v30 = vor.u32 %v1320_v21, %v1109_v20 }
  0x4a   :  { %v1114_v31 = vor.u32 %v1316_v22, %v1111_v23  ;;  %v824_v22 = vpack.c.b16 %v792_v14, %v792_v14  ;;  %v825_v23 = vpack.c.b16 %v793_v15, %v793_v15  ;;  %v830_v14 = vpack.c.b16 %v798_v6, %v798_v6 }
  0x4b   :  { %v831_v15 = vpack.c.b16 %v799_v7, %v799_v7 }
  0x4f   :  { %361 = vmatpush.bf16.xpose.msrb.mxu0 %v1022_v38  ;;  %374 = vmatpush.bf16.xpose.msrb.mxu1 %v1026_v39  ;;  %v96_v38 = vld [vmem:[#allocation4 + $0x10] sm:$0xff]  ;;  %v97_v39 = vld [vmem:[#allocation4 + $0x18] sm:$0xff] }
  0x50   :  { %387 = vmatpush.bf16.xpose.msrb.mxu2 %v1030_v40  ;;  %400 = vmatpush.bf16.xpose.msrb.mxu3 %v1034_v41  ;;  %v1181_v40 = vld [vmem:[#allocation7 + $0x170] sm:$0xf]  ;;  %v104_v50 = vpack.c.bf16 %v96_v38, %v96_v38  ;;  %v105_v51 = vpack.c.bf16 %v97_v39, %v97_v39  ;;  %v1360_v39 = vld [vmem:[#allocation7 + $0x264] sm:$0xf0] }
  0x51   :  { %v1337_v41 = vld [vmem:[#allocation7 + $0x18c] sm:$0xf0] }
  0x56   :  { %362 = vmatmul.bf16.vlgmr.msrb.gmra.mxu0 %v90_v52  ;;  %375 = vmatmul.bf16.vlgmr.msrb.gmra.mxu1 %v91_v56  ;;  %v1182_v52 = vor.u32 %v1337_v41, %v1181_v40  ;;  %v1149_v56 = vld [vmem:[#allocation7 + $0x130] sm:$0xf]  ;;  %v1356_v40 = vld [vmem:[#allocation7 + $0x24c] sm:$0xf] }
  0x57   :  { %587 = vmatpush.bf16.xpose.msra.mxu0 %v543_v42  ;;  %600 = vmatpush.bf16.xpose.msra.mxu1 %v544_v43  ;;  %v1333_v42 = vld [vmem:[#allocation7 + $0x174] sm:$0xf]  ;;  %v1271_v41 = vld [vmem:[#allocation7 + $0x268] sm:$0xf0] }
  0x58   :  { %613 = vmatpush.bf16.xpose.msra.mxu2 %v545_v44  ;;  %626 = vmatpush.bf16.xpose.msra.mxu3 %v546_v45  ;;  %v1183_v43 = vld [vmem:[#allocation7 + $0x190] sm:$0xf0]  ;;  %v1189_v44 = vld [vmem:[#allocation7 + $0x178] sm:$0xf]  ;;  %v102_v45 = vpack.c.bf16 %v94_v36, %v94_v36  ;;  %v107_v36 = vpack.c.bf16 %v99_v27, %v99_v27 }
  0x59   :  { %388 = vmatmul.bf16.vlgmr.msrb.gmra.mxu2 %v92_v57  ;;  %401 = vmatmul.bf16.vlgmr.msrb.gmra.mxu3 %v93_v58  ;;  %v1186_v53 = vor.u32 %v1333_v42, %v1183_v43  ;;  %v1190_v54 = vor.u32 %v1338_v47, %v1189_v44  ;;  %v1329_v57 = vld [vmem:[#allocation7 + $0x14c] sm:$0xf0]  ;;  %v1325_v58 = vld [vmem:[#allocation7 + $0x134] sm:$0xf]  ;;  %v1351_v47 = vld [vmem:[#allocation7 + $0x21c] sm:$0xf0] }
  0x5f   :  { %588 = vmatpush.bf16.xpose.msra.mxu0 %v1166_v62  ;;  %601 = vmatpush.bf16.xpose.msra.mxu1 %v1170_v63  ;;  %v1326_v62 = vld [vmem:[#allocation7 + $0x13c] sm:$0xf] }
  0x60   :  { %614 = vmatpush.bf16.xpose.msra.mxu2 %v1174_v0  ;;  %627 = vmatpush.bf16.xpose.msra.mxu3 %v1178_v1  ;;  %v1159_v63 = vld [vmem:[#allocation7 + $0x158] sm:$0xf0]  ;;  %v1150_v0 = vor.u32 %v1329_v57, %v1149_v56  ;;  %v1154_v1 = vor.u32 %v1325_v58, %v1151_v59  ;;  %v714_v58 = vld [vmem:[#allocation7 + $0x290] sm:$0x11]  ;;  %v1197_v59 = vld [vmem:[#allocation7 + $0x1c0] sm:$0xf] }
  0x61   :  { %v1162_v3 = vor.u32 %v1326_v62, %v1159_v63  ;;  %v1339_v62 = vld [vmem:[#allocation7 + $0x1c4] sm:$0xf]  ;;  %v796_v4 = vunpack.c.l.b16 %v714_v58  ;;  %v797_v5 = vunpack.c.h.b16 %v714_v58  ;;  %v1198_v8 = vor.u32 %v1343_v60, %v1197_v59 }
  0x62   :  { %v1199_v63 = vld [vmem:[#allocation7 + $0x1e0] sm:$0xf0] }
  0x63   :  { %v1202_v9 = vor.u32 %v1339_v62, %v1199_v63  ;;  %v114_v60 = vld [vmem:[#allocation6 + $0x20] sm:$0xff]  ;;  %v116_v62 = vld [vmem:[#allocation6 + $0x30] sm:$0xff]  ;;  %v117_v63 = vld [vmem:[#allocation6 + $0x38] sm:$0xff] }
  0x64   :  { %v125_v6 = vpack.c.bf16 %v117_v63, %v117_v63 }
  0x67   :  { %589 = vmatpush.bf16.xpose.msra.mxu0 %v1134_v10  ;;  %602 = vmatpush.bf16.xpose.msra.mxu1 %v1138_v11  ;;  %v1125_v10 = vld [vmem:[#allocation7 + $0xf8] sm:$0xf] }
  0x68   :  { %615 = vmatpush.bf16.xpose.msra.mxu2 %v1142_v12  ;;  %628 = vmatpush.bf16.xpose.msra.mxu3 %v1146_v13  ;;  %v1322_v11 = vld [vmem:[#allocation7 + $0x114] sm:$0xf0]  ;;  %v1318_v12 = vld [vmem:[#allocation7 + $0xfc] sm:$0xf] }
  0x69   :  { %v1127_v13 = vld [vmem:[#allocation7 + $0x118] sm:$0xf0]  ;;  %v1126_v20 = vor.u32 %v1322_v11, %v1125_v10 }
  0x6a   :  { %v1130_v21 = vor.u32 %v1318_v12, %v1127_v13  ;;  %v828_v12 = vpack.c.b16 %v796_v4, %v796_v4  ;;  %v829_v13 = vpack.c.b16 %v797_v5, %v797_v5  ;;  %v124_v5 = vpack.c.bf16 %v116_v62, %v116_v62 }
  0x6f   :  { %590 = vmatpush.bf16.xpose.msra.mxu0 %v1102_v28  ;;  %603 = vmatpush.bf16.xpose.msra.mxu1 %v1106_v29  ;;  %v100_v28 = vld [vmem:[#allocation4 + $0x30] sm:$0xff]  ;;  %v101_v29 = vld [vmem:[#allocation4 + $0x38] sm:$0xff] }
  0x70   :  { %616 = vmatpush.bf16.xpose.msra.mxu2 %v1110_v30  ;;  %629 = vmatpush.bf16.xpose.msra.mxu3 %v1114_v31  ;;  %v1261_v30 = vld [vmem:[#allocation7 + $0x240] sm:$0xf]  ;;  %v108_v37 = vpack.c.bf16 %v100_v28, %v100_v28  ;;  %v109_v38 = vpack.c.bf16 %v101_v29, %v101_v29  ;;  %v1362_v28 = vld [vmem:[#allocation7 + $0x274] sm:$0xf0]  ;;  %v1358_v29 = vld [vmem:[#allocation7 + $0x25c] sm:$0xf] }
  0x71   :  { %v1359_v31 = vld [vmem:[#allocation7 + $0x25c] sm:$0xf0] }
  0x72   :  { %v1262_v42 = vor.u32 %v1359_v31, %v1261_v30  ;;  %v1287_v30 = vld [vmem:[#allocation7 + $0x278] sm:$0xf0] }
  0x76   :  { %591 = vmatmul.bf16.vlgmr.msra.gmra.mxu0 %v102_v45  ;;  %604 = vmatmul.bf16.vlgmr.msra.gmra.mxu1 %v103_v46  ;;  %v1274_v45 = vor.u32 %v1356_v40, %v1271_v41  ;;  %v1229_v46 = vld [vmem:[#allocation7 + $0x200] sm:$0xf]  ;;  %v1253_v40 = vld [vmem:[#allocation7 + $0x218] sm:$0xf] }
  0x77   :  { %639 = vmatpush.bf16.xpose.msrb.mxu0 %v547_v32  ;;  %652 = vmatpush.bf16.xpose.msrb.mxu1 %v548_v33  ;;  %v106_v32 = vpack.c.bf16 %v98_v26, %v98_v26  ;;  %v1355_v33 = vld [vmem:[#allocation7 + $0x244] sm:$0xf]  ;;  %v119_v26 = vpack.c.bf16 %v111_v17, %v111_v17  ;;  %v1354_v41 = vld [vmem:[#allocation7 + $0x234] sm:$0xf0] }
  0x78   :  { %665 = vmatpush.bf16.xpose.msrb.mxu2 %v549_v34  ;;  %678 = vmatpush.bf16.xpose.msrb.mxu3 %v550_v35  ;;  %v1263_v34 = vld [vmem:[#allocation7 + $0x260] sm:$0xf0]  ;;  %v1269_v35 = vld [vmem:[#allocation7 + $0x248] sm:$0xf] }
  0x79   :  { %617 = vmatmul.bf16.vlgmr.msra.gmra.mxu2 %v104_v50  ;;  %630 = vmatmul.bf16.vlgmr.msra.gmra.mxu3 %v105_v51  ;;  %v1266_v43 = vor.u32 %v1355_v33, %v1263_v34  ;;  %v1270_v44 = vor.u32 %v1360_v39, %v1269_v35  ;;  %v1237_v50 = vld [vmem:[#allocation7 + $0x208] sm:$0xf]  ;;  %v1290_v35 = vor.u32 %v1358_v29, %v1287_v30  ;;  %v1247_v39 = vld [vmem:[#allocation7 + $0x230] sm:$0xf0] }
  0x7a   :  { %v1352_v51 = vld [vmem:[#allocation7 + $0x224] sm:$0xf0] }
  0x7b   :  { %v1238_v56 = vor.u32 %v1352_v51, %v1237_v50  ;;  %v1341_v50 = vld [vmem:[#allocation7 + $0x1d4] sm:$0xf] }
  0x7c   :  { %v1215_v51 = vld [vmem:[#allocation7 + $0x1f0] sm:$0xf0] }
  0x7f   :  { %640 = vmatpush.bf16.xpose.msrb.mxu0 %v1182_v52  ;;  %653 = vmatpush.bf16.xpose.msrb.mxu1 %v1186_v53  ;;  %v1348_v52 = vld [vmem:[#allocation7 + $0x20c] sm:$0xf] }
  0x80   :  { %666 = vmatpush.bf16.xpose.msrb.mxu2 %v1190_v54  ;;  %679 = vmatpush.bf16.xpose.msrb.mxu3 %v1194_v55  ;;  %v1239_v53 = vld [vmem:[#allocation7 + $0x228] sm:$0xf0]  ;;  %v1230_v54 = vor.u32 %v1351_v47, %v1229_v46  ;;  %v1234_v55 = vor.u32 %v1347_v48, %v1231_v49  ;;  %v1254_v46 = vor.u32 %v1354_v41, %v1253_v40  ;;  %v1213_v48 = vld [vmem:[#allocation7 + $0x1d0] sm:$0xf] }
  0x81   :  { %v1242_v57 = vor.u32 %v1348_v52, %v1239_v53  ;;  %v1345_v49 = vld [vmem:[#allocation7 + $0x1ec] sm:$0xf0]  ;;  %v1221_v52 = vld [vmem:[#allocation7 + $0x1d8] sm:$0xf] }
  0x82   :  { %v1346_v53 = vld [vmem:[#allocation7 + $0x1f4] sm:$0xf0] }
  0x83   :  { %v1222_v58 = vor.u32 %v1346_v53, %v1221_v52 }
  0x87   :  { %641 = vmatpush.bf16.xpose.msrb.mxu0 %v1150_v0  ;;  %654 = vmatpush.bf16.xpose.msrb.mxu1 %v1154_v1  ;;  %v1205_v0 = vld [vmem:[#allocation7 + $0x1c8] sm:$0xf] }
  0x88   :  { %667 = vmatpush.bf16.xpose.msrb.mxu2 %v1158_v2  ;;  %680 = vmatpush.bf16.xpose.msrb.mxu3 %v1162_v3  ;;  %v1344_v1 = vld [vmem:[#allocation7 + $0x1e4] sm:$0xf0]  ;;  %v1340_v2 = vld [vmem:[#allocation7 + $0x1cc] sm:$0xf] }
  0x89   :  { %v1207_v3 = vld [vmem:[#allocation7 + $0x1e8] sm:$0xf0]  ;;  %v1206_v10 = vor.u32 %v1344_v1, %v1205_v0 }
  0x8a   :  { %v1210_v11 = vor.u32 %v1340_v2, %v1207_v3  ;;  %v122_v2 = vpack.c.bf16 %v114_v60, %v114_v60  ;;  %v123_v3 = vpack.c.bf16 %v115_v61, %v115_v61 }
  0x8f   :  { %642 = vmatpush.bf16.xpose.msrb.mxu0 %v1118_v18  ;;  %655 = vmatpush.bf16.xpose.msrb.mxu1 %v1122_v19  ;;  %v112_v18 = vld [vmem:[#allocation6 + $0x10] sm:$0xff]  ;;  %v113_v19 = vld [vmem:[#allocation6 + $0x18] sm:$0xff] }
  0x90   :  { %668 = vmatpush.bf16.xpose.msrb.mxu2 %v1126_v20  ;;  %681 = vmatpush.bf16.xpose.msrb.mxu3 %v1130_v21  ;;  %v1277_v20 = vld [vmem:[#allocation7 + $0x250] sm:$0xf]  ;;  %v120_v27 = vpack.c.bf16 %v112_v18, %v112_v18  ;;  %v121_v31 = vpack.c.bf16 %v113_v19, %v113_v19 }
  0x91   :  { %v1361_v21 = vld [vmem:[#allocation7 + $0x26c] sm:$0xf0] }
  0x96   :  { %643 = vmatmul.bf16.vlgmr.msrb.gmra.mxu0 %v106_v32  ;;  %656 = vmatmul.bf16.vlgmr.msrb.gmra.mxu1 %v107_v36  ;;  %v1278_v32 = vor.u32 %v1361_v21, %v1277_v20  ;;  %v1245_v36 = vld [vmem:[#allocation7 + $0x210] sm:$0xf] }
  0x97   :  { %868 = vmatpush.bf16.xpose.msra.mxu0 %v824_v22  ;;  %881 = vmatpush.bf16.xpose.msra.mxu1 %v825_v23  ;;  %v1357_v22 = vld [vmem:[#allocation7 + $0x254] sm:$0xf] }
  0x98   :  { %894 = vmatpush.bf16.xpose.msra.mxu2 %v826_v24  ;;  %907 = vmatpush.bf16.xpose.msra.mxu3 %v827_v25  ;;  %v1279_v23 = vld [vmem:[#allocation7 + $0x270] sm:$0xf0]  ;;  %v1285_v24 = vld [vmem:[#allocation7 + $0x258] sm:$0xf]  ;;  %v118_v25 = vpack.c.bf16 %v110_v16, %v110_v16 }
  0x99   :  { %669 = vmatmul.bf16.vlgmr.msrb.gmra.mxu2 %v108_v37  ;;  %682 = vmatmul.bf16.vlgmr.msrb.gmra.mxu3 %v109_v38  ;;  %v1282_v33 = vor.u32 %v1357_v22, %v1279_v23  ;;  %v1286_v34 = vor.u32 %v1362_v28, %v1285_v24  ;;  %v1353_v37 = vld [vmem:[#allocation7 + $0x22c] sm:$0xf0]  ;;  %v1349_v38 = vld [vmem:[#allocation7 + $0x214] sm:$0xf] }
  0x9f   :  { %869 = vmatpush.bf16.xpose.msra.mxu0 %v1262_v42  ;;  %882 = vmatpush.bf16.xpose.msra.mxu1 %v1266_v43  ;;  %v1350_v42 = vld [vmem:[#allocation7 + $0x21c] sm:$0xf] }
  0xa0   :  { %895 = vmatpush.bf16.xpose.msra.mxu2 %v1270_v44  ;;  %908 = vmatpush.bf16.xpose.msra.mxu3 %v1274_v45  ;;  %v1255_v43 = vld [vmem:[#allocation7 + $0x238] sm:$0xf0]  ;;  %v1246_v44 = vor.u32 %v1353_v37, %v1245_v36  ;;  %v1250_v45 = vor.u32 %v1349_v38, %v1247_v39 }
  0xa1   :  { %v1258_v47 = vor.u32 %v1350_v42, %v1255_v43 }
  0xa7   :  { %870 = vmatpush.bf16.xpose.msra.mxu0 %v1230_v54  ;;  %883 = vmatpush.bf16.xpose.msra.mxu1 %v1234_v55  ;;  %v1342_v54 = vld [vmem:[#allocation7 + $0x1dc] sm:$0xf] }
  0xa8   :  { %896 = vmatpush.bf16.xpose.msra.mxu2 %v1238_v56  ;;  %909 = vmatpush.bf16.xpose.msra.mxu3 %v1242_v57  ;;  %v1223_v55 = vld [vmem:[#allocation7 + $0x1f8] sm:$0xf0]  ;;  %v1214_v56 = vor.u32 %v1345_v49, %v1213_v48  ;;  %v1218_v57 = vor.u32 %v1341_v50, %v1215_v51 }
  0xa9   :  { %v1226_v59 = vor.u32 %v1342_v54, %v1223_v55 }
  0xaf   :  { %871 = vmatpush.bf16.xpose.msra.mxu0 %v1198_v8  ;;  %884 = vmatpush.bf16.xpose.msra.mxu1 %v1202_v9 }
  0xb0   :  { %897 = vmatpush.bf16.xpose.msra.mxu2 %v1206_v10  ;;  %910 = vmatpush.bf16.xpose.msra.mxu3 %v1210_v11 }
  0xb3   :  { %v311_v0 = vpop.f32.mrf.mxu0  ;;  %v324_v1 = vpop.f32.mrf.mxu1 }
  0xb4   :  { %v325_v4 = vadd.f32 %v324_v1, %v311_v0 }
  0xb6   :  { %872 = vmatmul.bf16.vlgmr.msra.gmra.mxu0 %v118_v25  ;;  %885 = vmatmul.bf16.vlgmr.msra.gmra.mxu1 %v119_v26 }
  0xb7   :  { %920 = vmatpush.bf16.xpose.msrb.mxu0 %v828_v12  ;;  %933 = vmatpush.bf16.xpose.msrb.mxu1 %v829_v13 }
  0xb8   :  { %946 = vmatpush.bf16.xpose.msrb.mxu2 %v830_v14  ;;  %959 = vmatpush.bf16.xpose.msrb.mxu3 %v831_v15 }
  0xb9   :  { %898 = vmatmul.bf16.vlgmr.msra.gmra.mxu2 %v120_v27  ;;  %911 = vmatmul.bf16.vlgmr.msra.gmra.mxu3 %v121_v31 }
  0xbb   :  { %v313_v10 = vpop.f32.mrf.mxu0  ;;  %v326_v11 = vpop.f32.mrf.mxu1 }
  0xbc   :  { %v337_v7 = vpop.f32.mrf.mxu2  ;;  %v350_v8 = vpop.f32.mrf.mxu3 }
  0xbd   :  { %v338_v9 = vadd.f32 %v337_v7, %v325_v4 }
  0xbf   :  { %921 = vmatpush.bf16.xpose.msrb.mxu0 %v1278_v32  ;;  %934 = vmatpush.bf16.xpose.msrb.mxu1 %v1282_v33  ;;  %v351_v12 = vadd.f32 %v350_v8, %v338_v9 }
  0xc0   :  { %947 = vmatpush.bf16.xpose.msrb.mxu2 %v1286_v34  ;;  %960 = vmatpush.bf16.xpose.msrb.mxu3 %v1290_v35 }
  0xc4   :  { %v339_v13 = vpop.f32.mrf.mxu2  ;;  %v352_v14 = vpop.f32.mrf.mxu3 }
  0xc7   :  { %922 = vmatpush.bf16.xpose.msrb.mxu0 %v1246_v44  ;;  %935 = vmatpush.bf16.xpose.msrb.mxu1 %v1250_v45 }
  0xc8   :  { %948 = vmatpush.bf16.xpose.msrb.mxu2 %v1254_v46  ;;  %961 = vmatpush.bf16.xpose.msrb.mxu3 %v1258_v47 }
  0xcf   :  { %923 = vmatpush.bf16.xpose.msrb.mxu0 %v1214_v56  ;;  %936 = vmatpush.bf16.xpose.msrb.mxu1 %v1218_v57 }
  0xd0   :  { %949 = vmatpush.bf16.xpose.msrb.mxu2 %v1222_v58  ;;  %962 = vmatpush.bf16.xpose.msrb.mxu3 %v1226_v59 }
  0xd3   :  { %v363_v15 = vpop.f32.mrf.mxu0  ;;  %v376_v16 = vpop.f32.mrf.mxu1 }
  0xd4   :  { %v364_v17 = vadd.f32 %v363_v15, %v351_v12  ;;  %v1371_v15 = vld [vmem:[%s1534_s4] ss:$0 sm:$0xff] }
  0xd6   :  { %924 = vmatmul.bf16.vlgmr.msrb.gmra.mxu0 %v122_v2  ;;  %937 = vmatmul.bf16.vlgmr.msrb.gmra.mxu1 %v123_v3  ;;  %v377_v18 = vadd.f32 %v376_v16, %v364_v17 }
  0xd7   :  { %950 = vmatmul.bf16.vlgmr.msrb.gmra.mxu2 %v124_v5  ;;  %963 = vmatmul.bf16.vlgmr.msrb.gmra.mxu3 %v125_v6 }
  0xdb   :  { %v365_v22 = vpop.f32.mrf.mxu0  ;;  %v378_v23 = vpop.f32.mrf.mxu1 }
  0xdc   :  { %v389_v19 = vpop.f32.mrf.mxu2  ;;  %v402_v20 = vpop.f32.mrf.mxu3 }
  0xdd   :  { %v390_v21 = vadd.f32 %v389_v19, %v377_v18 }
  0xdf   :  { %v403_v24 = vadd.f32 %v402_v20, %v390_v21 }
  0xe4   :  { %v391_v25 = vpop.f32.mrf.mxu2  ;;  %v404_v26 = vpop.f32.mrf.mxu3 }
  0xf3   :  { %v592_v27 = vpop.f32.mrf.mxu0  ;;  %v605_v28 = vpop.f32.mrf.mxu1 }
  0xf4   :  { %v606_v33 = vadd.f32 %v605_v28, %v592_v27 }
  0xfb   :  { %v594_v31 = vpop.f32.mrf.mxu0  ;;  %v607_v32 = vpop.f32.mrf.mxu1 }
  0xfc   :  { %v618_v29 = vpop.f32.mrf.mxu2  ;;  %v631_v30 = vpop.f32.mrf.mxu3 }
  0xfd   :  { %v619_v36 = vadd.f32 %v618_v29, %v606_v33 }
  0xff   :  { %v632_v37 = vadd.f32 %v631_v30, %v619_v36 }
 0x104   :  { %v620_v34 = vpop.f32.mrf.mxu2  ;;  %v633_v35 = vpop.f32.mrf.mxu3 }
 0x113   :  { %v644_v38 = vpop.f32.mrf.mxu0  ;;  %v657_v39 = vpop.f32.mrf.mxu1 }
 0x114   :  { %v645_v40 = vadd.f32 %v644_v38, %v632_v37 }
 0x116   :  { %v658_v41 = vadd.f32 %v657_v39, %v645_v40 }
 0x11b   :  { %v646_v45 = vpop.f32.mrf.mxu0  ;;  %v659_v46 = vpop.f32.mrf.mxu1 }
 0x11c   :  { %v670_v42 = vpop.f32.mrf.mxu2  ;;  %v683_v43 = vpop.f32.mrf.mxu3 }
 0x11d   :  { %v671_v44 = vadd.f32 %v670_v42, %v658_v41 }
 0x11f   :  { %v684_v47 = vadd.f32 %v683_v43, %v671_v44 }
 0x121   :  { %971 = vrot.lane.b32.xlu0 %v684_v47, %s1480_s2  ;;  %v968_v6 = vadd.f32 %v684_v47, %v403_v24 }
 0x124   :  { %v672_v48 = vpop.f32.mrf.mxu2  ;;  %v685_v49 = vpop.f32.mrf.mxu3 }
 0x133   :  { %v873_v50 = vpop.f32.mrf.mxu0  ;;  %v886_v51 = vpop.f32.mrf.mxu1 }
 0x134   :  { %v887_v58 = vadd.f32 %v886_v51, %v873_v50 }
 0x13b   :  { %v875_v54 = vpop.f32.mrf.mxu0  ;;  %v888_v55 = vpop.f32.mrf.mxu1 }
 0x13c   :  { %v899_v52 = vpop.f32.mrf.mxu2  ;;  %v912_v53 = vpop.f32.mrf.mxu3 }
 0x13d   :  { %v900_v59 = vadd.f32 %v899_v52, %v887_v58 }
 0x13f   :  { %v913_v60 = vadd.f32 %v912_v53, %v900_v59 }
 0x144   :  { %v901_v56 = vpop.f32.mrf.mxu2  ;;  %v914_v57 = vpop.f32.mrf.mxu3 }
 0x153   :  { %v925_v61 = vpop.f32.mrf.mxu0  ;;  %v938_v62 = vpop.f32.mrf.mxu1 }
 0x154   :  { %v926_v63 = vadd.f32 %v925_v61, %v913_v60 }
 0x156   :  { %v939_v0 = vadd.f32 %v938_v62, %v926_v63 }
 0x15a   :  { %v951_v1 = vpop.f32.mrf.mxu2  ;;  %v964_v2 = vpop.f32.mrf.mxu3 }
 0x15b   :  { %v952_v3 = vadd.f32 %v951_v1, %v939_v0  ;;  %v927_v4 = vpop.f32.mrf.mxu0  ;;  %v940_v5 = vpop.f32.mrf.mxu1 }
 0x15d   :  { %v965_v7 = vadd.f32 %v964_v2, %v952_v3 }
 0x15f   :  { %975 = vrot.lane.b32.xlu0 %v965_v7, %s1481_s3  ;;  %v969_v8 = vadd.f32 %v968_v6, %v965_v7 }
 0x161   :  { %979 = vrot.lane.b32.xlu1 %v969_v8, %s1481_s3 }
 0x162   :  { %v953_v9 = vpop.f32.mrf.mxu2  ;;  %v966_v10 = vpop.f32.mrf.mxu3 }
 0x193   :  { %v972_v11 = vpop.permute.xlu0 %971 }
 0x194   :  { %v983_v12 = vsel %vm982_vm0, %v403_v24, %v972_v11 }
 0x1d1   :  { %v976_v13 = vpop.permute.xlu0 %975 }
 0x1d2   :  { %v985_v14 = vsel %vm984_vm1, %v983_v12, %v976_v13 }
 0x1d3   :  { %v980_v16 = vpop.permute.xlu1 %979 }
 0x1d4   :  { %v987_v17 = vsel %vm986_vm2, %v985_v14, %v980_v16 }
 0x1d5   :  { %v989_v18 = vsel %vm988_vm3, %v987_v17, 0.0 }
 0x1d6   :  { %v994_v19 = vadd.f32 %v1371_v15, %v989_v18 }
 0x1d8   :  { %995 = vst [vmem:[%s1535_s5] sm:$0xff] %v994_v19 }
 0x1d9   :  { %1000 = vsyncpa [#allocation3], 1 }
 0x1da   :  { %1001 = vsyncpa [#allocation5], 1 }
 0x1db   :  { %1002 = vsyncpa [#allocation8], 1 }

</bundles_post_ra>
